<compile_context>
chip_gen: v7x
topology: tpu7x:2x2x1
jax: 0.10.0
libtpu: 0.0.40
codegen_flags: <defaults>
</compile_context>

<pallas_src>
import math
from functools import partial

import jax
import jax.numpy as jnp
from jax.experimental import pallas as pl
from jax.experimental.pallas import tpu as pltpu


# ------------------------- tiled linear (MXU matmul) -------------------------


def _matmul_kernel(x_ref, w_ref, o_ref, acc_ref):
    @pl.when(pl.program_id(2) == 0)
    def _():
        acc_ref[...] = jnp.zeros_like(acc_ref)

    acc_ref[...] += jnp.dot(
        x_ref[...], w_ref[...], preferred_element_type=jnp.float32
    )

    @pl.when(pl.program_id(2) == pl.num_programs(2) - 1)
    def _():
        o_ref[...] = acc_ref[...].astype(o_ref.dtype)


def _pick_tile(dim, target):
    # Use the target tile when it divides the dim, otherwise fall back to the
    # full dim (always satisfies the (8,128) block constraint).
    if dim <= target:
        return dim
    return target if dim % target == 0 else dim


def pallas_linear(x, w, *, tm=256, tn=256, tk=512):
    """y = x @ w with x:(M,K), w:(K,N); tiled, double-buffered, f32 accumulation."""
    M, K = x.shape
    K2, N = w.shape
    assert K == K2
    tm = _pick_tile(M, tm)
    tn = _pick_tile(N, tn)
    tk = _pick_tile(K, tk)
    grid = (M // tm, N // tn, K // tk)

    cost = pl.CostEstimate(
        flops=2 * M * N * K,
        transcendentals=0,
        bytes_accessed=(M * K + K * N + M * N) * x.dtype.itemsize,
    )
    return pl.pallas_call(
        _matmul_kernel,
        out_shape=jax.ShapeDtypeStruct((M, N), x.dtype),
        grid_spec=pltpu.PrefetchScalarGridSpec(
            num_scalar_prefetch=0,
            grid=grid,
            in_specs=[
                pl.BlockSpec((tm, tk), lambda i, j, k: (i, k)),
                pl.BlockSpec((tk, tn), lambda i, j, k: (k, j)),
            ],
            out_specs=pl.BlockSpec((tm, tn), lambda i, j, k: (i, j)),
            scratch_shapes=[pltpu.VMEM((tm, tn), jnp.float32)],
        ),
        compiler_params=pltpu.CompilerParams(
            dimension_semantics=("parallel", "parallel", "arbitrary")
        ),
        cost_estimate=cost,
    )(x, w)


# ----------------- block-diagonal causal attention (per chunk) ----------------


def _attn_chunk_kernel(q_ref, k_ref, v_ref, o_ref, *, scale):
    # Blocks are (1, L, D): one (batch, mini-chunk, head) triple per grid step.
    q = q_ref[0]  # (L, D) native dtype (bf16 stays bf16 on the MXU)
    k = k_ref[0]  # (L, D)
    v = v_ref[0]  # (L, D)
    L = q.shape[0]

    # Scale the (L, D) operand instead of the (L, L) scores.
    qs = q * scale
    s = jax.lax.dot_general(
        qs, k, (((1,), (1,)), ((), ())), preferred_element_type=jnp.float32
    )  # (L, L) == q @ k.T, f32 accumulation

    # Causal mask within the chunk (block-diagonal structure handled by grid).
    q_pos = jax.lax.broadcasted_iota(jnp.int32, (L, L), 0)
    k_pos = jax.lax.broadcasted_iota(jnp.int32, (L, L), 1)
    s = jnp.where(q_pos >= k_pos, s, -1e30)

    m = jnp.max(s, axis=-1, keepdims=True)
    p = jnp.exp(s - m)
    denom = jnp.sum(p, axis=-1, keepdims=True)
    out = jnp.dot(p.astype(v.dtype), v, preferred_element_type=jnp.float32)
    out = out * pl.reciprocal(denom, approx=True)  # EUP, not VPU divide
    o_ref[0] = out.astype(o_ref.dtype)
    # TODO(synk): for very long chunks (>=2048), additionally tile the KV axis
    # with an online-softmax (m/l/acc) accumulator and skip fully-masked tiles.


def pallas_block_causal_attention(q, k, v, *, num_heads, num_kv_heads, head_dim, mini):
    """q:(B,S,H*D), k/v:(B,S,Hk*D) -> (B,S,H*D); block-diagonal causal attention.

    GQA head sharing is done via the K/V index_map (no jnp.repeat)."""
    B, S, _ = q.shape
    H, Hk, D = num_heads, num_kv_heads, head_dim
    groups = H // Hk
    assert S % mini == 0
    L = S // mini
    assert L % 8 == 0 and D % 128 == 0, "chunk_len / head_dim must be TPU-tile aligned"
    scale = 1.0 / math.sqrt(D)

    kern = partial(_attn_chunk_kernel, scale=scale)
    q_spec = pl.BlockSpec((1, L, D), lambda b, c, h: (b, c, h))
    kv_spec = pl.BlockSpec((1, L, D), lambda b, c, h: (b, c, h // groups))
    o_spec = pl.BlockSpec((1, L, D), lambda b, c, h: (b, c, h))

    cost = pl.CostEstimate(
        flops=4 * B * H * S * L * D,            # QK^T + PV per chunk
        transcendentals=B * H * S * L,          # exp
        bytes_accessed=(2 * q.size + 2 * k.size) * q.dtype.itemsize,
    )
    return pl.pallas_call(
        kern,
        out_shape=jax.ShapeDtypeStruct((B, S, H * D), q.dtype),
        grid_spec=pltpu.PrefetchScalarGridSpec(
            num_scalar_prefetch=0,
            grid=(B, mini, H),  # head innermost: KV tile reused within a GQA group
            in_specs=[q_spec, kv_spec, kv_spec],
            out_specs=o_spec,
        ),
        compiler_params=pltpu.CompilerParams(
            dimension_semantics=("parallel", "parallel", "parallel")
        ),
        cost_estimate=cost,
    )(q, k, v)


# ------------------------------- JAX glue ------------------------------------


def rotate_half(x):
    x1, x2 = jnp.split(x, 2, axis=-1)
    return jnp.concatenate([-x2, x1], axis=-1)


def rope_cos_sin(position_ids, head_dim, theta):
    inv_freq = 1.0 / (
        theta ** (jnp.arange(0, head_dim, 2, dtype=jnp.float32) / head_dim)
    )
    freqs = position_ids.astype(jnp.float32)[..., None] * inv_freq[None, None, :]
    emb = jnp.concatenate([freqs, freqs], axis=-1)  # (B, S, D)
    return jnp.cos(emb), jnp.sin(emb)


def llama_flash_attention2_forward(
    hidden_states, position_ids, params, *, num_heads, num_kv_heads, head_dim,
    rope_theta, mini
):
    B, S, hidden = hidden_states.shape
    assert S % mini == 0
    H, Hk, D = num_heads, num_kv_heads, head_dim
    x2d = hidden_states.reshape(B * S, hidden)

    # Fused q/k/v projection: one matmul, x read from HBM once.
    w_qkv = jnp.concatenate([params["wq"], params["wk"], params["wv"]], axis=1)
    qkv = pallas_linear(x2d, w_qkv)  # (B*S, (H + 2*Hk) * D)
    q = qkv[:, : H * D].reshape(B, S, H, D)
    k = qkv[:, H * D:(H + Hk) * D].reshape(B, S, Hk, D)
    v = qkv[:, (H + Hk) * D:].reshape(B, S, Hk * D)

    # RoPE applied in (B, S, heads, D) layout — no (B,H,S,D) transposes anywhere.
    cos, sin = rope_cos_sin(position_ids, D, rope_theta)  # (B, S, D)
    cos = cos[:, :, None, :].astype(q.dtype)
    sin = sin[:, :, None, :].astype(q.dtype)
    q = (q * cos + rotate_half(q) * sin).reshape(B, S, H * D)
    k = (k * cos + rotate_half(k) * sin).reshape(B, S, Hk * D)
    # TODO(synk): fold RoPE into the attention kernel (cos/sin as extra tiled
    # inputs) to remove these two full-tensor HBM round trips.

    attn = pallas_block_causal_attention(
        q, k, v, num_heads=H, num_kv_heads=Hk, head_dim=D, mini=mini
    )  # (B, S, H*D) — already in the layout o_proj wants

    out = pallas_linear(attn.reshape(B * S, H * D), params["wo"])
    return out.reshape(B, S, hidden)
    # TODO(synk): attention_mask (var-len unpad) and KV-cache paths not
    # exercised (forward is called with attention_mask=None, past_key_value=None).


# --------------------------- pure-JAX reference -------------------------------


def reference_forward(hidden_states, position_ids, params, *, num_heads,
                      num_kv_heads, head_dim, rope_theta, mini):
    B, S, hidden = hidden_states.shape
    x2d = hidden_states.reshape(B * S, hidden)
    q = (x2d @ params["wq"]).reshape(B, S, num_heads, head_dim).transpose(0, 2, 1, 3)
    k = (x2d @ params["wk"]).reshape(B, S, num_kv_heads, head_dim).transpose(0, 2, 1, 3)
    v = (x2d @ params["wv"]).reshape(B, S, num_kv_heads, head_dim).transpose(0, 2, 1, 3)
    cos, sin = rope_cos_sin(position_ids, head_dim, rope_theta)
    cos, sin = cos[:, None], sin[:, None]
    q = q * cos + rotate_half(q) * sin
    k = k * cos + rotate_half(k) * sin
    groups = num_heads // num_kv_heads
    k = jnp.repeat(k, groups, axis=1)
    v = jnp.repeat(v, groups, axis=1)
    scale = 1.0 / math.sqrt(head_dim)
    s = jnp.einsum("bhqd,bhkd->bhqk", q, k) * scale
    qp = jnp.arange(S)[:, None]
    kp = jnp.arange(S)[None, :]
    chunk = S // mini
    mask = ((qp // chunk) == (kp // chunk)) & (qp >= kp)
    s = jnp.where(mask[None, None], s, -1e30)
    p = jax.nn.softmax(s, axis=-1)
    o = jnp.einsum("bhqk,bhkd->bhqd", p, v)
    o = o.transpose(0, 2, 1, 3).reshape(B * S, num_heads * head_dim)
    return (o @ params["wo"]).reshape(B, S, hidden)


# --------------------------------- main ---------------------------------------

if __name__ == "__main__":
    B = 2
    S = 32            # q_len, divisible by mini=4 -> chunk_len=8 (sublane aligned)
    num_heads = 4
    num_kv_heads = 2
    head_dim = 128    # lane-aligned head dim (realistic Llama head size)
    hidden = num_heads * head_dim  # 512
    rope_theta = 10000.0
    mini = 4

    key = jax.random.PRNGKey(0)
    k_x, k_q, k_k, k_v, k_o = jax.random.split(key, 5)

    hidden_states = jax.random.normal(k_x, (B, S, hidden), dtype=jnp.float32)
    position_ids = jnp.broadcast_to(jnp.arange(S, dtype=jnp.int32)[None, :], (B, S))

    # nn.Linear weights stored as (in_features, out_features), i.e. W^T, no bias.
    params = {
        "wq": 0.02 * jax.random.normal(k_q, (hidden, num_heads * head_dim), jnp.float32),
        "wk": 0.02 * jax.random.normal(k_k, (hidden, num_kv_heads * head_dim), jnp.float32),
        "wv": 0.02 * jax.random.normal(k_v, (hidden, num_kv_heads * head_dim), jnp.float32),
        "wo": 0.02 * jax.random.normal(k_o, (num_heads * head_dim, hidden), jnp.float32),
    }

    out = llama_flash_attention2_forward(
        hidden_states, position_ids, params,
        num_heads=num_heads, num_kv_heads=num_kv_heads, head_dim=head_dim,
        rope_theta=rope_theta, mini=mini,
    )
    out = jax.block_until_ready(out)

    ref = reference_forward(
        hidden_states, position_ids, params,
        num_heads=num_heads, num_kv_heads=num_kv_heads, head_dim=head_dim,
        rope_theta=rope_theta, mini=mini,
    )
    assert out.shape == (B, S, hidden)
    assert bool(jnp.all(jnp.isfinite(out)))
    assert bool(jnp.allclose(out, ref, rtol=5e-2, atol=1e-3))

    print("KERNEL_OK")
</pallas_src>

<mosaic_0001>
module attributes {stable_mosaic.version = 11 : i64} {
  func.func @_matmul_kernel(%arg0: i32, %arg1: i32, %arg2: i32, %arg3: memref<64x512xf32, #tpu.memory_space<vmem>>, %arg4: memref<512x256xf32, #tpu.memory_space<vmem>>, %arg5: memref<64x256xf32, #tpu.memory_space<vmem>>, %arg6: memref<64x256xf32, #tpu.memory_space<vmem>>) attributes {dimension_semantics = [#tpu.dimension_semantics<parallel>, #tpu.dimension_semantics<parallel>, #tpu.dimension_semantics<arbitrary>], iteration_bounds = array<i64: 1, 4, 1>, scalar_prefetch = 0 : i64, scratch_operands = 1 : i64, tpu.core_type = #tpu.core_type<tc>, window_params = [{transform_indices = @transform_0, window_bounds = array<i64: 64, 512>}, {transform_indices = @transform_1, window_bounds = array<i64: 512, 256>}, {transform_indices = @transform_2, window_bounds = array<i64: 64, 256>}]} {
    %c0_i32 = arith.constant 0 : i32
    %0 = arith.cmpi eq, %arg2, %c0_i32 : i32
    %1 = arith.extui %0 : i1 to i32
    %c0_i32_0 = arith.constant 0 : i32
    %2 = arith.cmpi ne, %1, %c0_i32_0 : i32
    scf.if %2 {
      %cst_10 = arith.constant 0.000000e+00 : f32
      %12 = vector.broadcast %cst_10 : f32 to vector<64x256xf32>
      %c0_11 = arith.constant 0 : index
      %c0_12 = arith.constant 0 : index
      %13 = vector.load %arg6[%c0_11, %c0_12] : memref<64x256xf32, #tpu.memory_space<vmem>>, vector<64x256xf32>
      tpu.vector_store %arg6[%c0_11, %c0_12], %12 {strides = array<i32>} : memref<64x256xf32, #tpu.memory_space<vmem>>, vector<64x256xf32>,
    } else {
    }
    %c0 = arith.constant 0 : index
    %c0_1 = arith.constant 0 : index
    %3 = vector.load %arg6[%c0, %c0_1] : memref<64x256xf32, #tpu.memory_space<vmem>>, vector<64x256xf32>
    %c0_2 = arith.constant 0 : index
    %c0_3 = arith.constant 0 : index
    %4 = vector.load %arg3[%c0_2, %c0_3] : memref<64x512xf32, #tpu.memory_space<vmem>>, vector<64x512xf32>
    %c0_4 = arith.constant 0 : index
    %c0_5 = arith.constant 0 : index
    %5 = vector.load %arg4[%c0_4, %c0_5] : memref<512x256xf32, #tpu.memory_space<vmem>>, vector<512x256xf32>
    %cst = arith.constant dense<0.000000e+00> : vector<64x256xf32>
    %6 = tpu.matmul %4, %5, %cst {dimension_numbers = #tpu.dot_dimension_numbers<[1], [0], [0], [1], [0, 0, 1, 1], [], []>} : vector<64x512xf32>, vector<512x256xf32>, vector<64x256xf32> -> vector<64x256xf32>
    %7 = arith.addf %3, %6 : vector<64x256xf32>
    %c0_6 = arith.constant 0 : index
    %c0_7 = arith.constant 0 : index
    %8 = vector.load %arg6[%c0_6, %c0_7] : memref<64x256xf32, #tpu.memory_space<vmem>>, vector<64x256xf32>
    tpu.vector_store %arg6[%c0_6, %c0_7], %7 {strides = array<i32>} : memref<64x256xf32, #tpu.memory_space<vmem>>, vector<64x256xf32>,
    %c0_i32_8 = arith.constant 0 : i32
    %9 = arith.cmpi eq, %arg2, %c0_i32_8 : i32
    %10 = arith.extui %9 : i1 to i32
    %c0_i32_9 = arith.constant 0 : i32
    %11 = arith.cmpi ne, %10, %c0_i32_9 : i32
    scf.if %11 {
      %c0_10 = arith.constant 0 : index
      %c0_11 = arith.constant 0 : index
      %12 = vector.load %arg6[%c0_10, %c0_11] : memref<64x256xf32, #tpu.memory_space<vmem>>, vector<64x256xf32>
      %c0_12 = arith.constant 0 : index
      %c0_13 = arith.constant 0 : index
      %13 = vector.load %arg5[%c0_12, %c0_13] : memref<64x256xf32, #tpu.memory_space<vmem>>, vector<64x256xf32>
      tpu.vector_store %arg5[%c0_12, %c0_13], %12 {strides = array<i32>} : memref<64x256xf32, #tpu.memory_space<vmem>>, vector<64x256xf32>,
    } else {
    }
    return
  }
  func.func @transform_0(%arg0: i32, %arg1: i32, %arg2: i32) -> (i32, i32) {
    %c0_i32 = arith.constant 0 : i32
    return %arg0, %arg2 : i32, i32
  }
  func.func @transform_1(%arg0: i32, %arg1: i32, %arg2: i32) -> (i32, i32) {
    %c0_i32 = arith.constant 0 : i32
    return %arg2, %arg1 : i32, i32
  }
  func.func @transform_2(%arg0: i32, %arg1: i32, %arg2: i32) -> (i32, i32) {
    %c0_i32 = arith.constant 0 : i32
    return %arg0, %arg1 : i32, i32
  }
}

</mosaic_0001>

<bundles_post_ra>
// kernel: tpu_custom_call.1
= control target key start
LH: loop header
LB: loop body
LE: loop exit
PB: predicated region body
PF: predicated region fallthrough
CT: control target
= control target key end

     0   :  { %7 = vsyncpa [#allocation4], 0  ;;  %s1612_s0 = inlined_call_operand.hbm [shape: f32[64,512], index: 0, kind: input, shape index: {}]   ;;  %s1613_s1 = inlined_call_operand.hbm [shape: f32[512,1024], index: 1, kind: input, shape index: {}]   ;;  %s1614_s2 = inlined_call_operand.hbm [shape: f32[64,1024], index: 2, kind: output, shape index: {}]  }
   0x1   :  { %8 = vsyncpa [#allocation7], 0 }
   0x2   :  { %10 = vsyncpa [#allocation7 + $0x1], 0 }
   0x3   :  { %11 = vsyncpa [#allocation5], 0 }
   0x4   :  { %13 = vsyncpa [#allocation5 + $0x1], 0  ;;  %s1251_s9 = smov 0   ;;  %s1253_s10 = smov 0  }
   0x5   :  { %s1255_s11 = smov 0   ;;  %s1257_s12 = smov 0  }
   0x6   :  { %s1259_s13 = smov 0   ;;  %s1261_s14 = smov 0  }
   0x7 LB: > { %s835_s15 = sadd.s32 4294967295, %s1223_s14   ;;  %s836_s16 = sadd.s32 4294967294, %s1223_s14   ;;  %s1223_s14 = sphi %s1261_s14, %s19_s14   ;;  %s1219_s13 = sphi %s1259_s13, %s1639_s13   ;;  %s1215_s12 = sphi %s1257_s12, %s1638_s12   ;;  %s1211_s11 = sphi %s1255_s11, %s1637_s11   ;;  %s1207_s10 = sphi %s1253_s10, %s1636_s10   ;;  %s1203_s9 = sphi %s1251_s9, %s1635_s9  }
   0x8   : > { %p82_p0 = scmp.ne.s32.totalorder %s1211_s11, %s1207_s10  ;;  %p83_p1 = scmp.eq.s32.totalorder %s1223_s14, 0 }
   0x9   : > { %p88_p2 = scmp.ne.s32.totalorder %s1207_s10, %s1203_s9  ;;  %p1288_p3 = scmp.eq.s32.totalorder %s835_s15, 0 }
   0xa   : > { %p1292_p4 = por %p83_p1, %p82_p0  ;;  %p114_p5 = scmp.eq.s32.totalorder %s835_s15, 3 }
   0xb   : > { %s1621_s17 = scalar_select %p1288_p3, 1, 0 }
   0xc   : > { %p1298_p6 = por %p1288_p3, %p88_p2  ;;  %p120_p7 = scmp.eq.s32.totalorder %s836_s16, 3 }
   0xd   : > { %p1302_p8 = por %p114_p5, %p82_p0  ;;  %p837_p9 = scmp.ge.s32.totalorder %s1223_s14, 1 }
   0xe   : > { %s1623_s19 = scalar_select %p1298_p6, 1, 0 }
   0xf   : > { %s1624_s20 = scalar_select %p1302_p8, 1, 0 }
  0x10   : > { %p1307_p10 = por %p120_p7, %p88_p2  ;;  %p127_p11 = scmp.lt.s32.totalorder %s1223_s14, 5 }
  0x11   : > { %s1225_s23 = smov [#allocation3]   ;;  %p1019_p0 = scmp.lt.s32.totalorder %s1223_s14, 4 }
  0x12   : > { %s1625_s21 = scalar_select %p1307_p10, 1, 0 }
  0x13   : > { %p1312_p12 = pnand %p837_p9, %p127_p11  ;;  %s145_s24 = sshll.u32 %s1225_s23, 4  ;;  %s146_s24 = int_to_ptr.vmem [resolvable:$true] %s145_s24 }
  0x14   : > { %p1327_p2 = pnand %p1019_p0, %p1292_p4  ;;  %s34_s27 = sadd.s32 1, %s1219_s13 }
  0x15   : > { %s1626_s22 = scalar_select %p1312_p12, 1, 0 }
  0x16   : > { %p1006_p13 = pneg %p1312_p12  ;;  %s1079_s30 = scalar_lea.hbm %s1612_s0, 4096 }
  0x17   : > { %s1628_s26 = scalar_select %p1327_p2, 1, 0 }
  0x18   : > { %p1321_p1 = pnand %p1006_p13, %p1288_p3  ;;  %p1080_p5 = scmp.ne.s32.totalorder %s1612_s0, %s1079_s30 }
  0x19   : > { %p1086_p4 = scmp.lt.u32.totalorder %s1079_s30, %s1612_s0 }
  0x1a   : > { %p1081_p7 = pneg %p1321_p1 }
  0x1c   : > { %p1082_p9 = pnand %p1081_p7, %p1080_p5 }
  0x1e   : > { %p1083_p11 = pneg %p1082_p9 }
  0x20   : > { %p1088_p13 = pnand %p1086_p4, %p1083_p11 }
  0x22   : > { %1091 = shalt.err (!%p1088_p13)
}
  0x23   : > { %s1092_s7 = scalar_lea.vmem %s146_s24, 4096  ;;  %p1100_p6 = scmp.lt.s32.totalorder %s146_s24, %s146_s24 }
  0x24   : > { %p1093_p0 = scmp.ne.s32.totalorder %s146_s24, %s1092_s7  ;;  %p1101_p3 = scmp.lt.s32.totalorder %s1092_s7, %s1092_s7 }
  0x26   : > { %p1095_p10 = pnand %p1093_p0, %p1081_p7  ;;  %p1102_p12 = por %p1101_p3, %p1100_p6 }
  0x28   : > { %p1096_p8 = pneg %p1095_p10 }
  0x2a   : > { %p1103_p2 = pnand %p1102_p12, %p1096_p8 }
  0x2c   : > { %1106 = shalt.err (!%p1103_p2)
}
  0x2d   : > { %s1226_s8 = smov 512   ;;  %s1227_s15 = smov 32  }
  0x2e   : > { %1009 = dma.hbm_to_vmem [thread:$0]  (!%p1321_p1), %s1612_s0, 4096, %s146_s24, [#allocation4], %s1226_s8, %s1226_s8, %s1227_s15  }
  0x2f   : > { %p36_p5 = scmp.ge.s32.totalorder %s34_s27, 4  ;;  %s75_s23 = sadd.s32 1, %s1211_s11 }
  0x30   : > { %s159_s28 = sand.u32 1, %s1211_s11   ;;  %s852_s3 = sshll.u32 %s1219_s13, 8 }
  0x31   : > { %s1641_s27 = smov (%p36_p5, %s34_s27), 0  ;;  %s840_s29 = sshll.u32 %s159_s28, 10 }
  0x32   : > { %s71_s30 = ssub.s32 %s1219_s13, %s1641_s27  ;;  %s1358_s25 = scalar_lea.hbm %s1613_s1, %s852_s3 }
  0x33   : > { %p73_p3 = scmp.eq.s32.totalorder %s71_s30, 0  ;;  %s163_s24 = scalar_lea.vmem [#allocation6], %s840_s29 }
  0x34   : > { %s173_s6 = sshll.u32 %s163_s24, 4  ;;  %s1365_s8 = scalar_lea.sflag [#allocation7], %s159_s28  ;;  %s1363_s6 = int_to_ptr.vmem [resolvable:$true] %s173_s6 }
  0x35   : > { %s1361_s7 = scalar_select %p73_p3, %s1211_s11, %s75_s23  }
  0x36   : > { %s1107_s15 = scalar_lea.hbm %s1358_s25, 16384  ;;  %p1629_p8 = scmp.ne.s32.totalorder %s1628_s26, 0 }
  0x37   : > { %p1108_p6 = scmp.ne.s32.totalorder %s1358_s25, %s1107_s15  ;;  %s1112_s30 = scalar_lea.hbm %s1613_s1, 65536 }
  0x38   : > { %p1109_p10 = pneg %p1629_p8  ;;  %p1113_p2 = scmp.lt.u32.totalorder %s1358_s25, %s1613_s1 }
  0x39   : > { %p1114_p7 = scmp.lt.u32.totalorder %s1112_s30, %s1107_s15  ;;  %p1116_p11 = scmp.lt.u32.totalorder %s1107_s15, %s1358_s25 }
  0x3a   : > { %p1110_p12 = pnand %p1109_p10, %p1108_p6 }
  0x3b   : > { %p1115_p9 = por %p1114_p7, %p1113_p2 }
  0x3c   : > { %p1111_p1 = pneg %p1110_p12 }
  0x3d   : > { %p1117_p4 = por %p1116_p11, %p1115_p9 }
  0x3f   : > { %p1118_p13 = pnand %p1117_p4, %p1111_p1 }
  0x41   : > { %1121 = shalt.err (!%p1118_p13)
}
  0x42   : > { %s1122_s23 = scalar_lea.vmem %s1363_s6, 16384  ;;  %s1228_s28 = smov [#allocation6]  }
  0x43   : > { %p1123_p0 = scmp.ne.s32.totalorder %s1363_s6, %s1122_s23  ;;  %s1127_s4 = sshll.u32 %s1228_s28, 4  ;;  %s1128_s4 = int_to_ptr.vmem [resolvable:$false] %s1127_s4 }
  0x44   : > { %s1129_s5 = scalar_lea.vmem %s1128_s4, 32768  ;;  %p1130_p6 = scmp.lt.s32.totalorder %s1363_s6, %s1128_s4 }
  0x45   : > { %p1125_p5 = pnand %p1123_p0, %p1109_p10  ;;  %p1131_p12 = scmp.lt.s32.totalorder %s1129_s5, %s1122_s23 }
  0x47   : > { %p1126_p3 = pneg %p1125_p5  ;;  %p1132_p2 = por %p1131_p12, %p1130_p6 }
  0x49   : > { %p1133_p7 = pnand %p1132_p2, %p1126_p3 }
  0x4b   : > { %1136 = shalt.err (!%p1133_p7)
}
  0x4c   : > { %s1229_s24 = smov 1024   ;;  %s1230_s15 = smov 256  }
  0x4d   : > { %s1231_s16 = smov 16   ;;  %p1630_p10 = scmp.ne.s32.totalorder %s1626_s22, 0 }
  0x4e   : > { %1013 = dma.hbm_to_vmem [thread:$0]  (!%p1629_p8), %s1358_s25, 16384, %s1363_s6, %s1365_s8, %s1229_s24, %s1230_s15, %s1231_s16  }
  0x4f   : > { %185 = sbr.rel (%p1630_p10) target bundleno = 419 (0x1a3), region = 28  ;;  %p1631_p1 = scmp.ne.s32.totalorder (!%p1630_p10), %s1621_s17, 0 }
  0x56   : > { %1190 = dma.done.wait (%p1631_p1), [#allocation4], 4096  }
  0x57   : > { %1192 = vsyncadd (%p1631_p1), [#allocation4], 4294963200  ;;  %s1400_s18 = sand.u32 1, %s1207_s10   ;;  %p1632_p8 = scmp.ne.s32.totalorder %s1623_s19, 0 }
  0x58   : > { %s845_s30 = sshll.u32 %s1400_s18, 10  ;;  %s192_s29 = scalar_lea.sflag [#allocation7], %s1400_s18 }
  0x59   : > { %s1404_s3 = scalar_lea.vmem [#allocation6], %s845_s30 }
  0x5a   : > { %1194 = dma.done.wait (%p1632_p8), %s192_s29, 16384  }
  0x5b   : > { %1196 = vsyncadd (%p1632_p8), %s192_s29, 4294950912  ;;  %v291_v0 = vld [vmem:[%s1404_s3 + $0x8] sm:$0xff]  ;;  %v293_v1 = vld [vmem:[%s1404_s3 + $0x18] sm:$0xff]  ;;  %s846_s17 = sshll.u32 %s1400_s18, 7  ;;  %s853_s22 = sshll.u32 %s1215_s12, 8 }
  0x5c   : > { %v355_v2 = vld [vmem:[%s1404_s3 + $0x208] sm:$0xff]  ;;  %v854_v3 = vpack.c.bf16 %v293_v1, %v291_v0  ;;  %v357_v4 = vld [vmem:[%s1404_s3 + $0x218] sm:$0xff]  ;;  %v290_v5 = vld [vmem:[%s1404_s3] sm:$0xff]  ;;  %s1539_s19 = scalar_lea.vmem [#allocation8], %s846_s17  ;;  %s1560_s8 = scalar_lea.hbm %s1614_s2, %s853_s22 }
  0x5d   : > { %v292_v6 = vld [vmem:[%s1404_s3 + $0x10] sm:$0xff]  ;;  %v918_v7 = vpack.c.bf16 %v357_v4, %v355_v2  ;;  %v354_v9 = vld [vmem:[%s1404_s3 + $0x200] sm:$0xff]  ;;  %v295_v11 = vld [vmem:[%s1404_s3 + $0x28] sm:$0xff]  ;;  %s728_s26 = sshll.u32 %s1539_s19, 4  ;;  %s712_s12 = scalar_lea.sflag [#allocation5], %s1400_s18  ;;  %s1562_s26 = int_to_ptr.vmem [resolvable:$true] %s728_s26 }
  0x5e   : > { %v856_v8 = vpack.c.bf16 %v292_v6, %v290_v5  ;;  %v356_v10 = vld [vmem:[%s1404_s3 + $0x210] sm:$0xff]  ;;  %855 = vmatprep.subr.bf16.mxu1 %v854_v3  ;;  %v297_v13 = vld [vmem:[%s1404_s3 + $0x38] sm:$0xff]  ;;  %v359_v14 = vld [vmem:[%s1404_s3 + $0x228] sm:$0xff]  ;;  %s1137_s23 = scalar_lea.vmem %s1562_s26, 2048  ;;  %p1633_p11 = scmp.ne.s32.totalorder %s1624_s20, 0 }
  0x5f   : > { %v920_v12 = vpack.c.bf16 %v356_v10, %v354_v9  ;;  %v361_v15 = vld [vmem:[%s1404_s3 + $0x238] sm:$0xff]  ;;  %919 = vmatprep.subr.bf16.mxu0 %v918_v7  ;;  %v858_v16 = vpack.c.bf16 %v297_v13, %v295_v11  ;;  %v294_v18 = vld [vmem:[%s1404_s3 + $0x20] sm:$0xff]  ;;  %v296_v19 = vld [vmem:[%s1404_s3 + $0x30] sm:$0xff]  ;;  %p1138_p9 = scmp.ne.s32.totalorder %s1562_s26, %s1137_s23  ;;  %s1232_s28 = smov [#allocation8]  }
  0x60   : > { %857 = vmatpush1.bf16.msra.mxu1 %v856_v8  ;;  %v922_v17 = vpack.c.bf16 %v361_v15, %v359_v14  ;;  %v358_v20 = vld [vmem:[%s1404_s3 + $0x220] sm:$0xff]  ;;  %v860_v21 = vpack.c.bf16 %v296_v19, %v294_v18  ;;  %v360_v22 = vld [vmem:[%s1404_s3 + $0x230] sm:$0xff]  ;;  %v299_v23 = vld [vmem:[%s1404_s3 + $0x48] sm:$0xff]  ;;  %s1141_s4 = sshll.u32 %s1232_s28, 4  ;;  %s1142_s4 = int_to_ptr.vmem [resolvable:$false] %s1141_s4 }
  0x61   : > { %921 = vmatpush1.bf16.msra.mxu0 %v920_v12  ;;  %v301_v24 = vld [vmem:[%s1404_s3 + $0x58] sm:$0xff]  ;;  %859 = vmatprep.subr.bf16.mxu1 %v858_v16  ;;  %v924_v25 = vpack.c.bf16 %v360_v22, %v358_v20  ;;  %v363_v27 = vld [vmem:[%s1404_s3 + $0x248] sm:$0xff]  ;;  %v298_v29 = vld [vmem:[%s1404_s3 + $0x40] sm:$0xff]  ;;  %p1139_p4 = pnand %p1138_p9, %p1633_p11  ;;  %s1143_s5 = scalar_lea.vmem %s1142_s4, 4096 }
  0x62   : > { %923 = vmatprep.subr.bf16.mxu0 %v922_v17  ;;  %v862_v26 = vpack.c.bf16 %v301_v24, %v299_v23  ;;  %v365_v28 = vld [vmem:[%s1404_s3 + $0x258] sm:$0xff]  ;;  %v300_v31 = vld [vmem:[%s1404_s3 + $0x50] sm:$0xff]  ;;  %v362_v32 = vld [vmem:[%s1404_s3 + $0x240] sm:$0xff]  ;;  %p1144_p0 = scmp.lt.s32.totalorder %s1562_s26, %s1142_s4  ;;  %p1145_p5 = scmp.lt.s32.totalorder %s1143_s5, %s1137_s23 }
  0x63   : > { %v926_v30 = vpack.c.bf16 %v365_v28, %v363_v27  ;;  %v364_v33 = vld [vmem:[%s1404_s3 + $0x250] sm:$0xff]  ;;  %v864_v34 = vpack.c.bf16 %v300_v31, %v298_v29  ;;  %v303_v35 = vld [vmem:[%s1404_s3 + $0x68] sm:$0xff]  ;;  %v305_v36 = vld [vmem:[%s1404_s3 + $0x78] sm:$0xff]  ;;  %p1140_p13 = pneg %p1139_p4 }
  0x64   : > { %861 = vmatpush1.bf16.msra.mxu1 %v860_v21  ;;  %v367_v37 = vld [vmem:[%s1404_s3 + $0x268] sm:$0xff]  ;;  %v928_v38 = vpack.c.bf16 %v364_v33, %v362_v32  ;;  %v866_v39 = vpack.c.bf16 %v305_v36, %v303_v35  ;;  %v369_v40 = vld [vmem:[%s1404_s3 + $0x278] sm:$0xff]  ;;  %v302_v41 = vld [vmem:[%s1404_s3 + $0x60] sm:$0xff]  ;;  %p1146_p3 = por %p1145_p5, %p1144_p0 }
  0x65   : > { %925 = vmatpush1.bf16.msra.mxu0 %v924_v25  ;;  %863 = vmatprep.subr.bf16.mxu1 %v862_v26  ;;  %v304_v42 = vld [vmem:[%s1404_s3 + $0x70] sm:$0xff]  ;;  %v930_v43 = vpack.c.bf16 %v369_v40, %v367_v37  ;;  %v366_v44 = vld [vmem:[%s1404_s3 + $0x260] sm:$0xff]  ;;  %v307_v46 = vld [vmem:[%s1404_s3 + $0x88] sm:$0xff] }
  0x66   : > { %927 = vmatprep.subr.bf16.mxu0 %v926_v30  ;;  %v368_v45 = vld [vmem:[%s1404_s3 + $0x270] sm:$0xff]  ;;  %v309_v47 = vld [vmem:[%s1404_s3 + $0x98] sm:$0xff]  ;;  %v371_v48 = vld [vmem:[%s1404_s3 + $0x288] sm:$0xff]  ;;  %v868_v50 = vpack.c.bf16 %v304_v42, %v302_v41  ;;  %p1147_p6 = pnand %p1146_p3, %p1140_p13 }
  0x67   : > { %v373_v49 = vld [vmem:[%s1404_s3 + $0x298] sm:$0xff]  ;;  %v932_v51 = vpack.c.bf16 %v368_v45, %v366_v44  ;;  %v870_v52 = vpack.c.bf16 %v309_v47, %v307_v46  ;;  %v306_v53 = vld [vmem:[%s1404_s3 + $0x80] sm:$0xff]  ;;  %v308_v54 = vld [vmem:[%s1404_s3 + $0x90] sm:$0xff] }
  0x68   : > { %865 = vmatpush1.bf16.msra.mxu1 %v864_v34  ;;  %v370_v55 = vld [vmem:[%s1404_s3 + $0x280] sm:$0xff]  ;;  %v934_v56 = vpack.c.bf16 %v373_v49, %v371_v48  ;;  %v372_v57 = vld [vmem:[%s1404_s3 + $0x290] sm:$0xff]  ;;  %v311_v58 = vld [vmem:[%s1404_s3 + $0xa8] sm:$0xff]  ;;  %v872_v62 = vpack.c.bf16 %v308_v54, %v306_v53 }
  0x69   : > { %929 = vmatpush1.bf16.msra.mxu0 %v928_v38  ;;  %867 = vmatprep.subr.bf16.mxu1 %v866_v39  ;;  %v313_v59 = vld [vmem:[%s1404_s3 + $0xb8] sm:$0xff]  ;;  %v375_v60 = vld [vmem:[%s1404_s3 + $0x2a8] sm:$0xff]  ;;  %v936_v63 = vpack.c.bf16 %v372_v57, %v370_v55  ;;  %v310_v1 = vld [vmem:[%s1404_s3 + $0xa0] sm:$0xff] }
  0x6a   : > { %931 = vmatprep.subr.bf16.mxu0 %v930_v43  ;;  %v377_v61 = vld [vmem:[%s1404_s3 + $0x2b8] sm:$0xff]  ;;  %v874_v0 = vpack.c.bf16 %v313_v59, %v311_v58  ;;  %v312_v2 = vld [vmem:[%s1404_s3 + $0xb0] sm:$0xff]  ;;  %v374_v3 = vld [vmem:[%s1404_s3 + $0x2a0] sm:$0xff] }
  0x6b   : > { %v938_v4 = vpack.c.bf16 %v377_v61, %v375_v60  ;;  %v376_v5 = vld [vmem:[%s1404_s3 + $0x2b0] sm:$0xff]  ;;  %v315_v6 = vld [vmem:[%s1404_s3 + $0xc8] sm:$0xff]  ;;  %v317_v7 = vld [vmem:[%s1404_s3 + $0xd8] sm:$0xff]  ;;  %v876_v10 = vpack.c.bf16 %v312_v2, %v310_v1 }
  0x6c   : > { %869 = vmatpush1.bf16.msra.mxu1 %v868_v50  ;;  %v379_v8 = vld [vmem:[%s1404_s3 + $0x2c8] sm:$0xff]  ;;  %v381_v9 = vld [vmem:[%s1404_s3 + $0x2d8] sm:$0xff]  ;;  %v940_v11 = vpack.c.bf16 %v376_v5, %v374_v3  ;;  %v878_v12 = vpack.c.bf16 %v317_v7, %v315_v6  ;;  %v314_v13 = vld [vmem:[%s1404_s3 + $0xc0] sm:$0xff] }
  0x6d   : > { %933 = vmatpush1.bf16.msra.mxu0 %v932_v51  ;;  %871 = vmatprep.subr.bf16.mxu1 %v870_v52  ;;  %v316_v14 = vld [vmem:[%s1404_s3 + $0xd0] sm:$0xff]  ;;  %v378_v15 = vld [vmem:[%s1404_s3 + $0x2c0] sm:$0xff]  ;;  %v942_v16 = vpack.c.bf16 %v381_v9, %v379_v8  ;;  %v319_v18 = vld [vmem:[%s1404_s3 + $0xe8] sm:$0xff] }
  0x6e   : > { %935 = vmatprep.subr.bf16.mxu0 %v934_v56  ;;  %v380_v17 = vld [vmem:[%s1404_s3 + $0x2d0] sm:$0xff]  ;;  %v321_v19 = vld [vmem:[%s1404_s3 + $0xf8] sm:$0xff]  ;;  %v383_v20 = vld [vmem:[%s1404_s3 + $0x2e8] sm:$0xff]  ;;  %v880_v22 = vpack.c.bf16 %v316_v14, %v314_v13 }
  0x6f   : > { %v385_v21 = vld [vmem:[%s1404_s3 + $0x2f8] sm:$0xff]  ;;  %v944_v23 = vpack.c.bf16 %v380_v17, %v378_v15  ;;  %v882_v24 = vpack.c.bf16 %v321_v19, %v319_v18  ;;  %v318_v25 = vld [vmem:[%s1404_s3 + $0xe0] sm:$0xff]  ;;  %v320_v26 = vld [vmem:[%s1404_s3 + $0xf0] sm:$0xff] }
  0x70   : > { %873 = vmatpush1.bf16.msra.mxu1 %v872_v62  ;;  %v382_v27 = vld [vmem:[%s1404_s3 + $0x2e0] sm:$0xff]  ;;  %v946_v28 = vpack.c.bf16 %v385_v21, %v383_v20  ;;  %v384_v29 = vld [vmem:[%s1404_s3 + $0x2f0] sm:$0xff]  ;;  %v323_v30 = vld [vmem:[%s1404_s3 + $0x108] sm:$0xff]  ;;  %v884_v34 = vpack.c.bf16 %v320_v26, %v318_v25 }
  0x71   : > { %937 = vmatpush1.bf16.msra.mxu0 %v936_v63  ;;  %875 = vmatprep.subr.bf16.mxu1 %v874_v0  ;;  %v325_v31 = vld [vmem:[%s1404_s3 + $0x118] sm:$0xff]  ;;  %v387_v32 = vld [vmem:[%s1404_s3 + $0x308] sm:$0xff]  ;;  %v948_v35 = vpack.c.bf16 %v384_v29, %v382_v27  ;;  %v322_v37 = vld [vmem:[%s1404_s3 + $0x100] sm:$0xff] }
  0x72   : > { %939 = vmatprep.subr.bf16.mxu0 %v938_v4  ;;  %v389_v33 = vld [vmem:[%s1404_s3 + $0x318] sm:$0xff]  ;;  %v886_v36 = vpack.c.bf16 %v325_v31, %v323_v30  ;;  %v324_v38 = vld [vmem:[%s1404_s3 + $0x110] sm:$0xff]  ;;  %v386_v39 = vld [vmem:[%s1404_s3 + $0x300] sm:$0xff] }
  0x73   : > { %v950_v40 = vpack.c.bf16 %v389_v33, %v387_v32  ;;  %v388_v41 = vld [vmem:[%s1404_s3 + $0x310] sm:$0xff]  ;;  %v327_v42 = vld [vmem:[%s1404_s3 + $0x128] sm:$0xff]  ;;  %v329_v43 = vld [vmem:[%s1404_s3 + $0x138] sm:$0xff]  ;;  %v888_v46 = vpack.c.bf16 %v324_v38, %v322_v37 }
  0x74   : > { %877 = vmatpush1.bf16.msra.mxu1 %v876_v10  ;;  %v391_v44 = vld [vmem:[%s1404_s3 + $0x328] sm:$0xff]  ;;  %v393_v45 = vld [vmem:[%s1404_s3 + $0x338] sm:$0xff]  ;;  %v952_v47 = vpack.c.bf16 %v388_v41, %v386_v39  ;;  %v890_v48 = vpack.c.bf16 %v329_v43, %v327_v42  ;;  %v326_v49 = vld [vmem:[%s1404_s3 + $0x120] sm:$0xff] }
  0x75   : > { %941 = vmatpush1.bf16.msra.mxu0 %v940_v11  ;;  %879 = vmatprep.subr.bf16.mxu1 %v878_v12  ;;  %v328_v50 = vld [vmem:[%s1404_s3 + $0x130] sm:$0xff]  ;;  %v390_v51 = vld [vmem:[%s1404_s3 + $0x320] sm:$0xff]  ;;  %v954_v52 = vpack.c.bf16 %v393_v45, %v391_v44  ;;  %v331_v54 = vld [vmem:[%s1404_s3 + $0x148] sm:$0xff] }
  0x76   : > { %943 = vmatprep.subr.bf16.mxu0 %v942_v16  ;;  %v392_v53 = vld [vmem:[%s1404_s3 + $0x330] sm:$0xff]  ;;  %v333_v55 = vld [vmem:[%s1404_s3 + $0x158] sm:$0xff]  ;;  %v395_v56 = vld [vmem:[%s1404_s3 + $0x348] sm:$0xff]  ;;  %v892_v58 = vpack.c.bf16 %v328_v50, %v326_v49 }
  0x77   : > { %v397_v57 = vld [vmem:[%s1404_s3 + $0x358] sm:$0xff]  ;;  %v956_v59 = vpack.c.bf16 %v392_v53, %v390_v51  ;;  %v894_v60 = vpack.c.bf16 %v333_v55, %v331_v54  ;;  %v330_v61 = vld [vmem:[%s1404_s3 + $0x140] sm:$0xff]  ;;  %v332_v62 = vld [vmem:[%s1404_s3 + $0x150] sm:$0xff] }
  0x78   : > { %881 = vmatpush1.bf16.msra.mxu1 %v880_v22  ;;  %v394_v63 = vld [vmem:[%s1404_s3 + $0x340] sm:$0xff]  ;;  %v958_v0 = vpack.c.bf16 %v397_v57, %v395_v56  ;;  %v396_v1 = vld [vmem:[%s1404_s3 + $0x350] sm:$0xff]  ;;  %v335_v2 = vld [vmem:[%s1404_s3 + $0x168] sm:$0xff]  ;;  %v896_v6 = vpack.c.bf16 %v332_v62, %v330_v61 }
  0x79   : > { %945 = vmatpush1.bf16.msra.mxu0 %v944_v23  ;;  %883 = vmatprep.subr.bf16.mxu1 %v882_v24  ;;  %v337_v3 = vld [vmem:[%s1404_s3 + $0x178] sm:$0xff]  ;;  %v399_v4 = vld [vmem:[%s1404_s3 + $0x368] sm:$0xff]  ;;  %v334_v7 = vld [vmem:[%s1404_s3 + $0x160] sm:$0xff]  ;;  %v960_v8 = vpack.c.bf16 %v396_v1, %v394_v63 }
  0x7a   : > { %947 = vmatprep.subr.bf16.mxu0 %v946_v28  ;;  %v401_v5 = vld [vmem:[%s1404_s3 + $0x378] sm:$0xff]  ;;  %v898_v9 = vpack.c.bf16 %v337_v3, %v335_v2  ;;  %v336_v10 = vld [vmem:[%s1404_s3 + $0x170] sm:$0xff]  ;;  %v398_v11 = vld [vmem:[%s1404_s3 + $0x360] sm:$0xff] }
  0x7b   : > { %v400_v12 = vld [vmem:[%s1404_s3 + $0x370] sm:$0xff]  ;;  %v962_v13 = vpack.c.bf16 %v401_v5, %v399_v4  ;;  %v339_v14 = vld [vmem:[%s1404_s3 + $0x188] sm:$0xff]  ;;  %v341_v15 = vld [vmem:[%s1404_s3 + $0x198] sm:$0xff]  ;;  %v900_v20 = vpack.c.bf16 %v336_v10, %v334_v7 }
  0x7c   : > { %885 = vmatpush1.bf16.msra.mxu1 %v884_v34  ;;  %v259_v16 = vld [vmem:[#allocation3 + $0x8] sm:$0xff]  ;;  %v405_v18 = vld [vmem:[%s1404_s3 + $0x398] sm:$0xff]  ;;  %v964_v21 = vpack.c.bf16 %v400_v12, %v398_v11  ;;  %v902_v22 = vpack.c.bf16 %v341_v15, %v339_v14  ;;  %v338_v23 = vld [vmem:[%s1404_s3 + $0x180] sm:$0xff] }
  0x7d   : > { %949 = vmatpush1.bf16.msra.mxu0 %v948_v35  ;;  %887 = vmatprep.subr.bf16.mxu1 %v886_v36  ;;  %v403_v17 = vld [vmem:[%s1404_s3 + $0x388] sm:$0xff]  ;;  %v261_v19 = vld [vmem:[#allocation3 + $0x18] sm:$0xff]  ;;  %v340_v24 = vld [vmem:[%s1404_s3 + $0x190] sm:$0xff] }
  0x7e   : > { %951 = vmatprep.subr.bf16.mxu0 %v950_v40  ;;  %482 = vmatprep.mubr.f32.mxu1 %v259_v16  ;;  %v402_v25 = vld [vmem:[%s1404_s3 + $0x380] sm:$0xff]  ;;  %v966_v26 = vpack.c.bf16 %v405_v18, %v403_v17  ;;  %v404_v27 = vld [vmem:[%s1404_s3 + $0x390] sm:$0xff]  ;;  %v343_v28 = vld [vmem:[%s1404_s3 + $0x1a8] sm:$0xff]  ;;  %v904_v32 = vpack.c.bf16 %v340_v24, %v338_v23 }
  0x7f   : > { %595 = vmatprep.mubr.f32.mxu0 %v261_v19  ;;  %v345_v29 = vld [vmem:[%s1404_s3 + $0x1b8] sm:$0xff]  ;;  %v407_v30 = vld [vmem:[%s1404_s3 + $0x3a8] sm:$0xff]  ;;  %v968_v33 = vpack.c.bf16 %v404_v27, %v402_v25  ;;  %v342_v35 = vld [vmem:[%s1404_s3 + $0x1a0] sm:$0xff] }
  0x80   : > { %889 = vmatpush1.bf16.msra.mxu1 %v888_v46  ;;  %v409_v31 = vld [vmem:[%s1404_s3 + $0x3b8] sm:$0xff]  ;;  %v906_v34 = vpack.c.bf16 %v345_v29, %v343_v28  ;;  %v344_v36 = vld [vmem:[%s1404_s3 + $0x1b0] sm:$0xff]  ;;  %v406_v37 = vld [vmem:[%s1404_s3 + $0x3a0] sm:$0xff] }
  0x81   : > { %953 = vmatpush1.bf16.msra.mxu0 %v952_v47  ;;  %891 = vmatprep.subr.bf16.mxu1 %v890_v48  ;;  %v970_v38 = vpack.c.bf16 %v409_v31, %v407_v30  ;;  %v408_v39 = vld [vmem:[%s1404_s3 + $0x3b0] sm:$0xff]  ;;  %v347_v40 = vld [vmem:[%s1404_s3 + $0x1c8] sm:$0xff]  ;;  %v349_v41 = vld [vmem:[%s1404_s3 + $0x1d8] sm:$0xff]  ;;  %v908_v44 = vpack.c.bf16 %v344_v36, %v342_v35 }
  0x82   : > { %955 = vmatprep.subr.bf16.mxu0 %v954_v52  ;;  %v411_v42 = vld [vmem:[%s1404_s3 + $0x3c8] sm:$0xff]  ;;  %v413_v43 = vld [vmem:[%s1404_s3 + $0x3d8] sm:$0xff]  ;;  %v972_v45 = vpack.c.bf16 %v408_v39, %v406_v37  ;;  %v910_v46 = vpack.c.bf16 %v349_v41, %v347_v40  ;;  %v346_v47 = vld [vmem:[%s1404_s3 + $0x1c0] sm:$0xff] }
  0x83   : > { %v348_v48 = vld [vmem:[%s1404_s3 + $0x1d0] sm:$0xff]  ;;  %v410_v49 = vld [vmem:[%s1404_s3 + $0x3c0] sm:$0xff]  ;;  %v974_v50 = vpack.c.bf16 %v413_v43, %v411_v42  ;;  %v351_v52 = vld [vmem:[%s1404_s3 + $0x1e8] sm:$0xff] }
  0x84   : > { %893 = vmatpush1.bf16.msra.mxu1 %v892_v58  ;;  %v412_v51 = vld [vmem:[%s1404_s3 + $0x3d0] sm:$0xff]  ;;  %v353_v53 = vld [vmem:[%s1404_s3 + $0x1f8] sm:$0xff]  ;;  %v415_v54 = vld [vmem:[%s1404_s3 + $0x3e8] sm:$0xff]  ;;  %v912_v56 = vpack.c.bf16 %v348_v48, %v346_v47 }
  0x85   : > { %957 = vmatpush1.bf16.msra.mxu0 %v956_v59  ;;  %895 = vmatprep.subr.bf16.mxu1 %v894_v60  ;;  %v417_v55 = vld [vmem:[%s1404_s3 + $0x3f8] sm:$0xff]  ;;  %v976_v57 = vpack.c.bf16 %v412_v51, %v410_v49  ;;  %v914_v58 = vpack.c.bf16 %v353_v53, %v351_v52  ;;  %v350_v59 = vld [vmem:[%s1404_s3 + $0x1e0] sm:$0xff]  ;;  %v352_v60 = vld [vmem:[%s1404_s3 + $0x1f0] sm:$0xff] }
  0x86   : > { %959 = vmatprep.subr.bf16.mxu0 %v958_v0  ;;  %v978_v61 = vpack.c.bf16 %v417_v55, %v415_v54  ;;  %v414_v62 = vld [vmem:[%s1404_s3 + $0x3e0] sm:$0xff]  ;;  %v416_v63 = vld [vmem:[%s1404_s3 + $0x3f0] sm:$0xff]  ;;  %v916_v0 = vpack.c.bf16 %v352_v60, %v350_v59  ;;  %v263_v4 = vld [vmem:[#allocation3 + $0x28] sm:$0xff] }
  0x87   : > { %v980_v1 = vpack.c.bf16 %v416_v63, %v414_v62  ;;  %v258_v2 = vld [vmem:[#allocation3] sm:$0xff]  ;;  %v260_v3 = vld [vmem:[#allocation3 + $0x10] sm:$0xff]  ;;  %v265_v5 = vld [vmem:[#allocation3 + $0x38] sm:$0xff] }
  0x88   : > { %897 = vmatpush1.bf16.msra.mxu1 %v896_v6  ;;  %v262_v6 = vld [vmem:[#allocation3 + $0x20] sm:$0xff]  ;;  %v264_v7 = vld [vmem:[#allocation3 + $0x30] sm:$0xff]  ;;  %v271_v12 = vld [vmem:[#allocation3 + $0x68] sm:$0xff] }
  0x89   : > { %961 = vmatpush1.bf16.msra.mxu0 %v960_v8  ;;  %899 = vmatprep.subr.bf16.mxu1 %v898_v9  ;;  %v267_v8 = vld [vmem:[#allocation3 + $0x48] sm:$0xff]  ;;  %v269_v9 = vld [vmem:[#allocation3 + $0x58] sm:$0xff]  ;;  %v266_v10 = vld [vmem:[#allocation3 + $0x40] sm:$0xff] }
  0x8a   : > { %963 = vmatprep.subr.bf16.mxu0 %v962_v13  ;;  %v268_v11 = vld [vmem:[#allocation3 + $0x50] sm:$0xff]  ;;  %v273_v13 = vld [vmem:[#allocation3 + $0x78] sm:$0xff]  ;;  %v270_v14 = vld [vmem:[#allocation3 + $0x60] sm:$0xff] }
  0x8b   : > { %v272_v15 = vld [vmem:[#allocation3 + $0x70] sm:$0xff]  ;;  %v275_v16 = vld [vmem:[#allocation3 + $0x88] sm:$0xff]  ;;  %v277_v17 = vld [vmem:[#allocation3 + $0x98] sm:$0xff] }
  0x8c   : > { %901 = vmatpush1.bf16.msra.mxu1 %v900_v20  ;;  %v274_v18 = vld [vmem:[#allocation3 + $0x80] sm:$0xff]  ;;  %v276_v19 = vld [vmem:[#allocation3 + $0x90] sm:$0xff]  ;;  %v279_v20 = vld [vmem:[#allocation3 + $0xa8] sm:$0xff] }
  0x8d   : > { %965 = vmatpush1.bf16.msra.mxu0 %v964_v21  ;;  %903 = vmatprep.subr.bf16.mxu1 %v902_v22  ;;  %v281_v21 = vld [vmem:[#allocation3 + $0xb8] sm:$0xff]  ;;  %v278_v22 = vld [vmem:[#allocation3 + $0xa0] sm:$0xff]  ;;  %v280_v23 = vld [vmem:[#allocation3 + $0xb0] sm:$0xff] }
  0x8e   : > { %967 = vmatprep.subr.bf16.mxu0 %v966_v26  ;;  %v283_v24 = vld [vmem:[#allocation3 + $0xc8] sm:$0xff]  ;;  %v285_v25 = vld [vmem:[#allocation3 + $0xd8] sm:$0xff]  ;;  %v282_v26 = vld [vmem:[#allocation3 + $0xc0] sm:$0xff] }
  0x8f   : > { %v284_v27 = vld [vmem:[#allocation3 + $0xd0] sm:$0xff]  ;;  %v287_v28 = vld [vmem:[#allocation3 + $0xe8] sm:$0xff]  ;;  %v289_v29 = vld [vmem:[#allocation3 + $0xf8] sm:$0xff] }
  0x90   : > { %905 = vmatpush1.bf16.msra.mxu1 %v904_v32  ;;  %v286_v30 = vld [vmem:[#allocation3 + $0xe0] sm:$0xff]  ;;  %v288_v31 = vld [vmem:[#allocation3 + $0xf0] sm:$0xff] }
  0x91   : > { %969 = vmatpush1.bf16.msra.mxu0 %v968_v33  ;;  %907 = vmatprep.subr.bf16.mxu1 %v906_v34 }
  0x92   : > { %971 = vmatprep.subr.bf16.mxu0 %v970_v38 }
  0x94   : > { %909 = vmatpush1.bf16.msra.mxu1 %v908_v44 }
  0x95   : > { %973 = vmatpush1.bf16.msra.mxu0 %v972_v45  ;;  %911 = vmatprep.subr.bf16.mxu1 %v910_v46 }
  0x96   : > { %975 = vmatprep.subr.bf16.mxu0 %v974_v50 }
  0x98   : > { %913 = vmatpush1.bf16.msra.mxu1 %v912_v56 }
  0x99   : > { %977 = vmatpush1.bf16.msra.mxu0 %v976_v57  ;;  %915 = vmatprep.subr.bf16.mxu1 %v914_v58 }
  0x9a   : > { %979 = vmatprep.subr.bf16.mxu0 %v978_v61 }
  0x9c   : > { %917 = vmatpush1.bf16.msra.mxu1 %v916_v0 }
  0x9d   : > { %981 = vmatpush1.bf16.msra.mxu0 %v980_v1 }
  0x9f   : > { %483 = vmatmul.mubr.f32.vlgmr.msra.gmra.mrb[0].mxu1 %v258_v2 }
  0xa0   : > { %596 = vmatmul.mubr.f32.vlgmr.msra.gmra.mrb[0].mxu0 %v260_v3  ;;  %488 = vmatprep.mubr.f32.mxu1 %v263_v4 }
  0xa1   : > { %601 = vmatprep.mubr.f32.mxu0 %v265_v5 }
  0xa3   : > { %489 = vmatmul.mubr.f32.gmra.mrb[2].mxu1 %v262_v6 }
  0xa4   : > { %602 = vmatmul.mubr.f32.gmra.mrb[2].mxu0 %v264_v7  ;;  %494 = vmatprep.mubr.f32.mxu1 %v267_v8 }
  0xa5   : > { %607 = vmatprep.mubr.f32.mxu0 %v269_v9 }
  0xa7   : > { %495 = vmatmul.mubr.f32.gmra.mrb[4].mxu1 %v266_v10 }
  0xa8   : > { %608 = vmatmul.mubr.f32.gmra.mrb[4].mxu0 %v268_v11  ;;  %500 = vmatprep.mubr.f32.mxu1 %v271_v12 }
  0xa9   : > { %613 = vmatprep.mubr.f32.mxu0 %v273_v13 }
  0xab   : > { %501 = vmatmul.mubr.f32.gmra.mrb[6].mxu1 %v270_v14 }
  0xac   : > { %614 = vmatmul.mubr.f32.gmra.mrb[6].mxu0 %v272_v15  ;;  %506 = vmatprep.mubr.f32.mxu1 %v275_v16 }
  0xad   : > { %619 = vmatprep.mubr.f32.mxu0 %v277_v17 }
  0xaf   : > { %507 = vmatmul.mubr.f32.gmra.mrb[8].mxu1 %v274_v18 }
  0xb0   : > { %620 = vmatmul.mubr.f32.gmra.mrb[8].mxu0 %v276_v19  ;;  %512 = vmatprep.mubr.f32.mxu1 %v279_v20 }
  0xb1   : > { %625 = vmatprep.mubr.f32.mxu0 %v281_v21 }
  0xb3   : > { %513 = vmatmul.mubr.f32.gmra.mrb[10].mxu1 %v278_v22 }
  0xb4   : > { %626 = vmatmul.mubr.f32.gmra.mrb[10].mxu0 %v280_v23  ;;  %518 = vmatprep.mubr.f32.mxu1 %v283_v24 }
  0xb5   : > { %631 = vmatprep.mubr.f32.mxu0 %v285_v25 }
  0xb7   : > { %519 = vmatmul.mubr.f32.gmra.mrb[12].mxu1 %v282_v26 }
  0xb8   : > { %632 = vmatmul.mubr.f32.gmra.mrb[12].mxu0 %v284_v27  ;;  %524 = vmatprep.mubr.f32.mxu1 %v287_v28 }
  0xb9   : > { %637 = vmatprep.mubr.f32.mxu0 %v289_v29 }
  0xbb   : > { %525 = vmatmul.mubr.f32.gmra.mrb[14].mxu1 %v286_v30 }
  0xbc   : > { %638 = vmatmul.mubr.f32.gmra.mrb[14].mxu0 %v288_v31 }
 0x172   : > { %v484_v32 = vpop.f32.mrb[0].mxu1 }
 0x173   : > { %v597_v33 = vpop.f32.mrb[0].mxu0  ;;  %v486_v34 = vpop.f32.mrb[1].mxu1 }
 0x174   : > { %v598_v35 = vadd.f32 %v597_v33, %v484_v32  ;;  %v599_v36 = vpop.f32.mrb[1].mxu0 }
 0x175   : > { %v600_v37 = vadd.f32 %v599_v36, %v486_v34 }
 0x176   : > { %695 = vst [vmem:[%s1539_s19] sm:$0xff] %v598_v35  ;;  %v490_v38 = vpop.f32.mrb[2].mxu1 }
 0x177   : > { %696 = vst [vmem:[%s1539_s19 + $0x8] sm:$0xff] %v600_v37  ;;  %v603_v39 = vpop.f32.mrb[2].mxu0  ;;  %v492_v40 = vpop.f32.mrb[3].mxu1 }
 0x178   : > { %v604_v41 = vadd.f32 %v603_v39, %v490_v38  ;;  %v605_v42 = vpop.f32.mrb[3].mxu0 }
 0x179   : > { %v606_v43 = vadd.f32 %v605_v42, %v492_v40 }
 0x17a   : > { %697 = vst [vmem:[%s1539_s19 + $0x10] sm:$0xff] %v604_v41  ;;  %v496_v44 = vpop.f32.mrb[4].mxu1 }
 0x17b   : > { %698 = vst [vmem:[%s1539_s19 + $0x18] sm:$0xff] %v606_v43  ;;  %v609_v45 = vpop.f32.mrb[4].mxu0  ;;  %v498_v46 = vpop.f32.mrb[5].mxu1 }
 0x17c   : > { %v610_v47 = vadd.f32 %v609_v45, %v496_v44  ;;  %v611_v48 = vpop.f32.mrb[5].mxu0 }
 0x17d   : > { %v612_v49 = vadd.f32 %v611_v48, %v498_v46 }
 0x17e   : > { %699 = vst [vmem:[%s1539_s19 + $0x20] sm:$0xff] %v610_v47  ;;  %v502_v50 = vpop.f32.mrb[6].mxu1 }
 0x17f   : > { %700 = vst [vmem:[%s1539_s19 + $0x28] sm:$0xff] %v612_v49  ;;  %v615_v51 = vpop.f32.mrb[6].mxu0  ;;  %v504_v52 = vpop.f32.mrb[7].mxu1 }
 0x180   : > { %v616_v53 = vadd.f32 %v615_v51, %v502_v50  ;;  %v617_v54 = vpop.f32.mrb[7].mxu0 }
 0x181   : > { %v618_v55 = vadd.f32 %v617_v54, %v504_v52 }
 0x182   : > { %701 = vst [vmem:[%s1539_s19 + $0x30] sm:$0xff] %v616_v53  ;;  %v508_v56 = vpop.f32.mrb[8].mxu1 }
 0x183   : > { %702 = vst [vmem:[%s1539_s19 + $0x38] sm:$0xff] %v618_v55  ;;  %v621_v57 = vpop.f32.mrb[8].mxu0  ;;  %v510_v58 = vpop.f32.mrb[9].mxu1 }
 0x184   : > { %v622_v59 = vadd.f32 %v621_v57, %v508_v56  ;;  %v623_v60 = vpop.f32.mrb[9].mxu0 }
 0x185   : > { %v624_v61 = vadd.f32 %v623_v60, %v510_v58 }
 0x186   : > { %703 = vst [vmem:[%s1539_s19 + $0x40] sm:$0xff] %v622_v59  ;;  %v514_v62 = vpop.f32.mrb[10].mxu1 }
 0x187   : > { %704 = vst [vmem:[%s1539_s19 + $0x48] sm:$0xff] %v624_v61  ;;  %v627_v63 = vpop.f32.mrb[10].mxu0  ;;  %v516_v0 = vpop.f32.mrb[11].mxu1 }
 0x188   : > { %v628_v1 = vadd.f32 %v627_v63, %v514_v62  ;;  %v629_v2 = vpop.f32.mrb[11].mxu0 }
 0x189   : > { %v630_v3 = vadd.f32 %v629_v2, %v516_v0 }
 0x18a   : > { %705 = vst [vmem:[%s1539_s19 + $0x50] sm:$0xff] %v628_v1  ;;  %v520_v4 = vpop.f32.mrb[12].mxu1 }
 0x18b   : > { %706 = vst [vmem:[%s1539_s19 + $0x58] sm:$0xff] %v630_v3  ;;  %v633_v5 = vpop.f32.mrb[12].mxu0  ;;  %v522_v6 = vpop.f32.mrb[13].mxu1 }
 0x18c   : > { %v634_v7 = vadd.f32 %v633_v5, %v520_v4  ;;  %v635_v8 = vpop.f32.mrb[13].mxu0 }
 0x18d   : > { %v636_v9 = vadd.f32 %v635_v8, %v522_v6 }
 0x18e   : > { %707 = vst [vmem:[%s1539_s19 + $0x60] sm:$0xff] %v634_v7  ;;  %v526_v10 = vpop.f32.mrb[14].mxu1 }
 0x18f   : > { %708 = vst [vmem:[%s1539_s19 + $0x68] sm:$0xff] %v636_v9  ;;  %v639_v11 = vpop.f32.mrb[14].mxu0  ;;  %v528_v12 = vpop.f32.mrb[15].mxu1 }
 0x190   : > { %v640_v13 = vadd.f32 %v639_v11, %v526_v10  ;;  %v641_v14 = vpop.f32.mrb[15].mxu0 }
 0x191   : > { %v642_v15 = vadd.f32 %v641_v14, %v528_v12 }
 0x192   : > { %709 = vst [vmem:[%s1539_s19 + $0x70] sm:$0xff] %v640_v13 }
 0x193   : > { %710 = vst [vmem:[%s1539_s19 + $0x78] sm:$0xff] %v642_v15 }
 0x194   : > { %1150 = shalt.err (!%p1147_p6)
}
 0x195   : > { %s1151_s24 = scalar_lea.hbm %s1560_s8, 2048  ;;  %s1155_s30 = scalar_lea.hbm %s1614_s2, 8192 }
 0x196   : > { %p1152_p12 = scmp.ne.s32.totalorder %s1560_s8, %s1151_s24  ;;  %p1156_p10 = scmp.lt.u32.totalorder %s1560_s8, %s1614_s2 }
 0x197   : > { %p1157_p1 = scmp.lt.u32.totalorder %s1155_s30, %s1151_s24  ;;  %p1159_p9 = scmp.lt.u32.totalorder %s1151_s24, %s1560_s8 }
 0x198   : > { %p1153_p2 = pnand %p1152_p12, %p1633_p11 }
 0x199   : > { %p1158_p8 = por %p1157_p1, %p1156_p10 }
 0x19a   : > { %p1154_p7 = pneg %p1153_p2 }
 0x19b   : > { %p1160_p4 = por %p1159_p9, %p1158_p8 }
 0x19d   : > { %p1161_p13 = pnand %p1160_p4, %p1154_p7 }
 0x19f   : > { %1164 = shalt.err (!%p1161_p13)
}
 0x1a0   : > { %s1233_s17 = smov 256   ;;  %s1234_s19 = smov 1024  }
 0x1a1   : > { %s1235_s22 = smov 16  }
 0x1a2   : > { %1004 = dma.vmem_to_hbm [thread:$0]  (%p1633_p11), %s1562_s26, 2048, %s1560_s8, %s712_s12, %s1233_s17, %s1234_s19, %s1235_s22  }
 0x1a3 PF: > { %p1021_p0 = scmp.ge.s32.totalorder %s1223_s14, 2  ;;  %s743_s25 = sand.u32 1, %s1203_s9  }
 0x1a4   : > { %p1634_p5 = scmp.ne.s32.totalorder %s1625_s21, 0  ;;  %s744_s6 = scalar_lea.sflag [#allocation5], %s743_s25 }
 0x1a6   : > { %p1015_p3 = pnand %p1021_p0, %p1634_p5 }
 0x1a8   : > { %1198 = dma.done.wait (!%p1015_p3), %s744_s6, 2048  }
 0x1a9   : > { %1200 = vsyncadd (!%p1015_p3), %s744_s6, 4294965248  ;;  %s19_s14 = sadd.s32 1, %s1223_s14   ;;  %s1635_s9 = smov %s1207_s10 }
 0x1aa   : > { %p16_p6 = scmp.ge.s32.totalorder %s19_s14, 6   ;;  %s1636_s10 = smov %s1211_s11 }
 0x1ab   : > { %s1637_s11 = smov %s1361_s7  ;;  %s1638_s12 = smov %s1219_s13 }
 0x1ac   : > { %s1639_s13 = smov %s1641_s27  ;;  %18 = sbr.rel (!%p16_p6) target bundleno = 7 (0x7), region = 87 }
 0x1b3   :  { %749 = vsyncpa [#allocation4], 1 }
 0x1b4   :  { %751 = vsyncpa [#allocation4 + $0x1], 1 }
 0x1b5   :  { %752 = vsyncpa [#allocation7], 1 }
 0x1b6   :  { %754 = vsyncpa [#allocation7 + $0x1], 1 }
 0x1b7   :  { %755 = vsyncpa [#allocation5], 1 }
 0x1b8   :  { %757 = vsyncpa [#allocation5 + $0x1], 1 }

</bundles_post_ra>
